<compile_context>
chip_gen: v5e
topology: v5e:2x2
jax: 0.10.0
libtpu: 0.0.40
codegen_flags: <defaults>
</compile_context>

<pallas_src>
import jax
import jax.numpy as jnp
from jax.experimental import pallas as pl
from jax.experimental.pallas import tpu as pltpu

LN_EPS = 1e-5  # torch.nn.LayerNorm default


def _round_up(x, m):
    return ((x + m - 1) // m) * m


def _vmem_capacity_bytes():
    """Physical VMEM per core; conservative (v7x-sized) fallback if unknown."""
    try:
        cap = int(getattr(pltpu.get_tpu_info(), "vmem_capacity_bytes", 0))
        if cap > 0:
            return cap
    except Exception:
        pass
    return 64 * 2**20


def _k_candidates(H):
    """W reduction-slab sizes: divisors of H that are multiples of 8 (largest
    first, preferring multiples of 128), with the full dim as a last resort."""
    cands = [c for c in (512, 384, 256, 128, 64, 32, 16, 8) if H % c == 0]
    cands.append(H)  # full-dim block is always layout-legal
    return cands


def _plan_tiles(rows, H, x_dtype, w_dtype):
    """Return (single_pass, row_tile, k_tile, vmem_limit)."""
    in_b = jnp.dtype(x_dtype).itemsize
    w_b = jnp.dtype(w_dtype).itemsize
    # Sublane multiple for the row (second-to-last) dim: 8 for f32, 16 for bf16.
    sub = 8 if in_b >= 4 else 16

    cap = _vmem_capacity_bytes()
    # Tile-solver budget: ~3/4 of physical VMEM (96 MiB on v5e/v6e, 48 MiB v7x).
    budget = (cap * 3) // 4
    vmem_limit = min(cap - (2 << 20), budget + (16 << 20))

    # Per-row VMEM cost: x + out tiles double-buffered + an f32 working copy.
    per_row = H * (2 * in_b + 2 * in_b + 4)
    small = 4 * H * 4  # gamma/beta (double-buffered), tiny

    rows_sub = _round_up(rows, sub)
    # Arithmetic-intensity floor: 2*row_tile/w_itemsize flops per W byte must
    # beat the chip flops:HBM-byte ratio (~700 worst case, v6e).
    ai_floor = 256 if in_b >= 4 else 512
    floor_rows = min(rows_sub, ai_floor)

    # ---- Single-pass plan: W resident in VMEM, no K grid axis. ----
    w_resident = 2 * H * H * w_b  # conservative: assume double-buffered slot
    if w_resident + small + max(floor_rows, sub) * per_row <= budget:
        avail = budget - w_resident - small
        row_tile = max(sub, min(avail // per_row, 1024, rows_sub) // sub * sub)
        # Keep >= 2 row tiles (when rows allow) for DMA/compute overlap and so
        # v7x megacore can shard the "parallel" row axis; otherwise let the
        # VMEM-derived tile stand (W is fetched once regardless of tile count).
        row_tile = min(row_tile, max(sub, _round_up(pl.cdiv(rows, 2), sub)))
        return True, row_tile, H, vmem_limit

    # ---- K-reduction plan: stream W in (k_tile, H) slabs. ----
    k_tile = None
    for cand in _k_candidates(H):
        if 2 * cand * H * w_b + small + floor_rows * per_row <= budget:
            k_tile = cand
            break
    if k_tile is None:
        # Pathological H: smallest legal slab, relax the intensity floor.
        divs = [c for c in (8, 16, 32, 64, 128) if H % c == 0]
        k_tile = divs[0] if divs else H
        floor_rows = sub

    fixed = 2 * k_tile * H * w_b + small
    avail = max(budget - fixed, sub * per_row)
    row_tile = max(sub, min(avail // per_row, 1024, rows_sub) // sub * sub)
    # Enforce the arithmetic-intensity floor so the W stream stays MXU-hidden.
    row_tile = min(max(row_tile, floor_rows), rows_sub)
    return False, row_tile, k_tile, vmem_limit


def _layernorm_f32(s, gamma, beta):
    mean = jnp.mean(s, axis=-1, keepdims=True)
    centered = s - mean
    var = jnp.mean(centered * centered, axis=-1, keepdims=True)
    inv_std = jax.lax.rsqrt(var + LN_EPS)
    return centered * inv_std * gamma.astype(jnp.float32) + beta.astype(jnp.float32)


def _sc_kernel_single_pass(x_ref, w_ref, gamma_ref, beta_ref, o_ref):
    """W fully resident: one matmul + residual + LayerNorm per row tile."""
    x = x_ref[...]
    lhs = x.astype(w_ref.dtype)  # no-op unless W was cast to bf16
    s = jnp.dot(lhs, w_ref[...], preferred_element_type=jnp.float32) \
        + x.astype(jnp.float32)
    o_ref[...] = _layernorm_f32(s, gamma_ref[...], beta_ref[...]).astype(o_ref.dtype)


def _sc_kernel_kstream(x_ref, w_ref, gamma_ref, beta_ref, o_ref, acc_ref):
    """W streamed along a trailing K axis into a resident f32 accumulator."""
    k = pl.program_id(1)
    k_tile = w_ref.shape[0]  # static block extent

    # First K step: seed the accumulator with the residual x (dropout = identity).
    @pl.when(k == 0)
    def _():
        acc_ref[...] = x_ref[...].astype(jnp.float32)

    start = pl.multiple_of(k * k_tile, k_tile)
    lhs = x_ref[:, pl.ds(start, k_tile)].astype(w_ref.dtype)
    acc_ref[...] += jnp.dot(lhs, w_ref[...], preferred_element_type=jnp.float32)

    # Last K step: LayerNorm(residual + sublayer(x)) over the hidden dim.
    @pl.when(k == pl.num_programs(1) - 1)
    def _():
        o_ref[...] = _layernorm_f32(
            acc_ref[...], gamma_ref[...], beta_ref[...]).astype(o_ref.dtype)


def sublayer_connection(x, w_sub, gamma, beta, *, cast_weights_to_bf16=False):
    """out = LayerNorm(x @ w_sub + x) with learnable (gamma, beta) over last dim.

    x: (batch, seq, hidden); w_sub: (hidden, hidden); gamma, beta: (hidden,)
    cast_weights_to_bf16: optional bandwidth/MXU-rate optimization on v6e/v7x
    (halves W HBM traffic, single-pass MXU); accumulation and LayerNorm stay f32.
    """
    B, S, H = x.shape
    assert w_sub.shape == (H, H)
    rows = B * S

    w = w_sub.astype(jnp.bfloat16) if cast_weights_to_bf16 else w_sub

    single_pass, row_tile, k_tile, vmem_limit = _plan_tiles(rows, H, x.dtype, w.dtype)

    rows_p = _round_up(rows, row_tile)
    x2 = x.reshape(rows, H)
    if rows_p != rows:
        # Zero-pad the row remainder (padded rows are sliced off below).
        x2 = jnp.pad(x2, ((0, rows_p - rows), (0, 0)))

    gamma2 = gamma.reshape(1, H)
    beta2 = beta.reshape(1, H)

    if single_pass:
        grid = (rows_p // row_tile,)
        grid_spec = pltpu.PrefetchScalarGridSpec(
            num_scalar_prefetch=0,
            grid=grid,
            in_specs=[
                pl.BlockSpec((row_tile, H), lambda i: (i, 0)),   # x row tile
                pl.BlockSpec((H, H), lambda i: (0, 0)),          # W resident (1 DMA)
                pl.BlockSpec((1, H), lambda i: (0, 0)),          # gamma
                pl.BlockSpec((1, H), lambda i: (0, 0)),          # beta
            ],
            out_specs=pl.BlockSpec((row_tile, H), lambda i: (i, 0)),
            scratch_shapes=[],
        )
        kernel = _sc_kernel_single_pass
        dim_sem = ("parallel",)
    else:
        grid = (rows_p // row_tile, H // k_tile)
        grid_spec = pltpu.PrefetchScalarGridSpec(
            num_scalar_prefetch=0,
            grid=grid,
            in_specs=[
                # x tile resident across K: fetched once per row tile, reused
                # for matmul LHS chunks and the residual.
                pl.BlockSpec((row_tile, H), lambda i, k: (i, 0)),
                # k-th input-dim slab of W, full (lane-dense) output width.
                pl.BlockSpec((k_tile, H), lambda i, k: (k, 0)),
                pl.BlockSpec((1, H), lambda i, k: (0, 0)),       # gamma
                pl.BlockSpec((1, H), lambda i, k: (0, 0)),       # beta
            ],
            # Same block index across k -> output resident, written once.
            out_specs=pl.BlockSpec((row_tile, H), lambda i, k: (i, 0)),
            scratch_shapes=[pltpu.VMEM((row_tile, H), jnp.float32)],
        )
        kernel = _sc_kernel_kstream
        dim_sem = ("parallel", "arbitrary")

    out = pl.pallas_call(
        kernel,
        out_shape=jax.ShapeDtypeStruct((rows_p, H), x.dtype),
        grid_spec=grid_spec,
        compiler_params=pltpu.CompilerParams(
            dimension_semantics=dim_sem,
            vmem_limit_bytes=vmem_limit,
        ),
    )(x2, w, gamma2, beta2)

    return out[:rows].reshape(B, S, H)


if __name__ == "__main__":
    # Small shapes implied by the module: (batch, seq, hidden) activation with
    # LayerNorm(size=hidden).
    B, S, H = 2, 8, 32
    key = jax.random.PRNGKey(0)
    kx, kw = jax.random.split(key)

    x = jax.random.normal(kx, (B, S, H), dtype=jnp.float32)
    # Deterministic "sublayer": a bias-free linear map of the same size,
    # fused into the kernel.
    w_sub = jax.random.normal(kw, (H, H), dtype=jnp.float32) * 0.1

    # nn.LayerNorm init: weight=1, bias=0.
    gamma = jnp.ones((H,), dtype=jnp.float32)
    beta = jnp.zeros((H,), dtype=jnp.float32)

    # TODO(synk): training-mode dropout (nn.Dropout) is identity in eval; a
    # pltpu.prng_* Bernoulli mask on the matmul result (before the residual add)
    # would be needed for train mode.

    out = sublayer_connection(x, w_sub, gamma, beta)
    jax.block_until_ready(out)

    # Pure-JAX reference of the PyTorch forward.
    s = jnp.einsum("bsh,hk->bsk", x, w_sub) + x
    mean = jnp.mean(s, axis=-1, keepdims=True)
    var = jnp.mean((s - mean) ** 2, axis=-1, keepdims=True)
    ref = (s - mean) / jnp.sqrt(var + LN_EPS) * gamma + beta
    assert jnp.allclose(out, ref, atol=1e-4, rtol=1e-4), "mismatch vs reference"

    print("KERNEL_OK")
</pallas_src>

<mosaic_0001>
module attributes {stable_mosaic.version = 11 : i64} {
  func.func @_sc_kernel_single_pass(%arg0: i32, %arg1: memref<8x32xf32, #tpu.memory_space<vmem>>, %arg2: memref<32x32xf32, #tpu.memory_space<vmem>>, %arg3: memref<1x32xf32, #tpu.memory_space<vmem>>, %arg4: memref<1x32xf32, #tpu.memory_space<vmem>>, %arg5: memref<8x32xf32, #tpu.memory_space<vmem>>) attributes {dimension_semantics = [#tpu.dimension_semantics<parallel>], iteration_bounds = array<i64: 2>, scalar_prefetch = 0 : i64, scratch_operands = 0 : i64, tpu.core_type = #tpu.core_type<tc>, window_params = [{transform_indices = @transform_0, window_bounds = array<i64: 8, 32>}, {pipeline_mode = #tpu.pipeline_mode<synchronous>, transform_indices = @transform_1, window_bounds = array<i64: 32, 32>}, {pipeline_mode = #tpu.pipeline_mode<synchronous>, transform_indices = @transform_2, window_bounds = array<i64: 1, 32>}, {pipeline_mode = #tpu.pipeline_mode<synchronous>, transform_indices = @transform_3, window_bounds = array<i64: 1, 32>}, {transform_indices = @transform_4, window_bounds = array<i64: 8, 32>}]} {
    %c0 = arith.constant 0 : index
    %c0_0 = arith.constant 0 : index
    %0 = vector.load %arg1[%c0, %c0_0] : memref<8x32xf32, #tpu.memory_space<vmem>>, vector<8x32xf32>
    %c0_1 = arith.constant 0 : index
    %c0_2 = arith.constant 0 : index
    %1 = vector.load %arg2[%c0_1, %c0_2] : memref<32x32xf32, #tpu.memory_space<vmem>>, vector<32x32xf32>
    %cst = arith.constant dense<0.000000e+00> : vector<8x32xf32>
    %2 = tpu.matmul %0, %1, %cst {dimension_numbers = #tpu.dot_dimension_numbers<[1], [0], [0], [1], [0, 0, 1, 1], [], []>} : vector<8x32xf32>, vector<32x32xf32>, vector<8x32xf32> -> vector<8x32xf32>
    %3 = arith.addf %2, %0 : vector<8x32xf32>
    %c0_3 = arith.constant 0 : index
    %c0_4 = arith.constant 0 : index
    %4 = vector.load %arg3[%c0_3, %c0_4] : memref<1x32xf32, #tpu.memory_space<vmem>>, vector<1x32xf32>
    %c0_5 = arith.constant 0 : index
    %c0_6 = arith.constant 0 : index
    %5 = vector.load %arg4[%c0_5, %c0_6] : memref<1x32xf32, #tpu.memory_space<vmem>>, vector<1x32xf32>
    %cst_7 = arith.constant dense<0.000000e+00> : vector<8xf32>
    %6 = vector.multi_reduction <add>, %3, %cst_7 [1] : vector<8x32xf32> to vector<8xf32>
    %7 = vector.shape_cast %6 : vector<8xf32> to vector<8x1xf32>
    %cst_8 = arith.constant 3.200000e+01 : f32
    %8 = vector.broadcast %cst_8 : f32 to vector<8x1xf32>
    %9 = arith.divf %7, %8 : vector<8x1xf32>
    %10 = vector.broadcast %9 : vector<8x1xf32> to vector<8x32xf32>
    %11 = arith.subf %3, %10 : vector<8x32xf32>
    %12 = arith.mulf %11, %11 : vector<8x32xf32>
    %cst_9 = arith.constant dense<0.000000e+00> : vector<8xf32>
    %13 = vector.multi_reduction <add>, %12, %cst_9 [1] : vector<8x32xf32> to vector<8xf32>
    %14 = vector.shape_cast %13 : vector<8xf32> to vector<8x1xf32>
    %cst_10 = arith.constant 3.200000e+01 : f32
    %15 = vector.broadcast %cst_10 : f32 to vector<8x1xf32>
    %16 = arith.divf %14, %15 : vector<8x1xf32>
    %cst_11 = arith.constant 9.99999974E-6 : f32
    %17 = vector.broadcast %cst_11 : f32 to vector<8x1xf32>
    %18 = arith.addf %16, %17 : vector<8x1xf32>
    %19 = math.rsqrt %18 : vector<8x1xf32>
    %20 = vector.broadcast %19 : vector<8x1xf32> to vector<8x32xf32>
    %21 = arith.mulf %11, %20 : vector<8x32xf32>
    %22 = vector.broadcast %4 : vector<1x32xf32> to vector<8x32xf32>
    %23 = arith.mulf %21, %22 : vector<8x32xf32>
    %24 = vector.broadcast %5 : vector<1x32xf32> to vector<8x32xf32>
    %25 = arith.addf %23, %24 : vector<8x32xf32>
    %c0_12 = arith.constant 0 : index
    %c0_13 = arith.constant 0 : index
    %26 = vector.load %arg5[%c0_12, %c0_13] : memref<8x32xf32, #tpu.memory_space<vmem>>, vector<8x32xf32>
    tpu.vector_store %arg5[%c0_12, %c0_13], %25 {strides = array<i32>} : memref<8x32xf32, #tpu.memory_space<vmem>>, vector<8x32xf32>,
    return
  }
  func.func @transform_0(%arg0: i32) -> (i32, i32) {
    %c0_i32 = arith.constant 0 : i32
    %c0_i32_0 = arith.constant 0 : i32
    return %arg0, %c0_i32 : i32, i32
  }
  func.func @transform_1(%arg0: i32) -> (i32, i32) {
    %c0_i32 = arith.constant 0 : i32
    %c0_i32_0 = arith.constant 0 : i32
    %c0_i32_1 = arith.constant 0 : i32
    return %c0_i32, %c0_i32_0 : i32, i32
  }
  func.func @transform_2(%arg0: i32) -> (i32, i32) {
    %c0_i32 = arith.constant 0 : i32
    %c0_i32_0 = arith.constant 0 : i32
    %c0_i32_1 = arith.constant 0 : i32
    return %c0_i32, %c0_i32_0 : i32, i32
  }
  func.func @transform_3(%arg0: i32) -> (i32, i32) {
    %c0_i32 = arith.constant 0 : i32
    %c0_i32_0 = arith.constant 0 : i32
    %c0_i32_1 = arith.constant 0 : i32
    return %c0_i32, %c0_i32_0 : i32, i32
  }
  func.func @transform_4(%arg0: i32) -> (i32, i32) {
    %c0_i32 = arith.constant 0 : i32
    %c0_i32_0 = arith.constant 0 : i32
    return %arg0, %c0_i32 : i32, i32
  }
}

</mosaic_0001>

<bundles_post_ra>
// kernel: tpu_custom_call.1
= control target key start
LH: loop header
LB: loop body
LE: loop exit
PB: predicated region body
PF: predicated region fallthrough
CT: control target
= control target key end

     0   :  { %9 = vsyncpa [#allocation3], 0  ;;  %s789_s0 = inlined_call_operand.hbm [shape: f32[16,32], index: 0, kind: input, shape index: {}]   ;;  %s790_s1 = inlined_call_operand.hbm [shape: f32[32,32], index: 1, kind: input, shape index: {}]   ;;  %s791_s2 = inlined_call_operand.vmem [shape: f32[1,32], index: 2, kind: input, shape index: {}]   ;;  %s792_s3 = inlined_call_operand.vmem [shape: f32[1,32], index: 3, kind: input, shape index: {}]   ;;  %s793_s4 = inlined_call_operand.hbm [shape: f32[16,32], index: 4, kind: output, shape index: {}]  }
   0x1   :  { %11 = vsyncpa [#allocation3 + $0x1], 0 }
   0x2   :  { %12 = vsyncpa [#allocation6], 0 }
   0x3   :  { %13 = vsyncpa [#allocation4], 0 }
   0x4   :  { %15 = vsyncpa [#allocation4 + $0x1], 0  ;;  %s639_s15 = smov 0   ;;  %s641_s16 = smov 0  }
   0x5   :  { %s643_s17 = smov 0   ;;  %s645_s18 = smov 0  }
   0x6 LB: > { %s152_s21 = sshll.u32 %s790_s1, 4  ;;  %s663_s22 = sadd.s32 4294967295, %s608_s18   ;;  %s608_s18 = sphi %s645_s18, %s803_s18   ;;  %s604_s17 = sphi %s643_s17, %s802_s17   ;;  %s600_s16 = sphi %s641_s16, %s801_s16   ;;  %s596_s15 = sphi %s639_s15, %s800_s15   ;;  %s153_s21 = int_to_ptr.hbm [resolvable:$true] %s152_s21 }
   0x7   : > { %p398_p0 = scmp.ge.s32.totalorder %s608_s18, 1  ;;  %p42_p1 = scmp.eq.s32.totalorder %s663_s22, 0 }
   0x8   : > { %p141_p2 = scmp.lt.s32.totalorder %s608_s18, 3  ;;  %s610_s24 = smov [#allocation5]  }
   0x9   : > { %s154_s25 = sshll.u32 %s610_s24, 4  ;;  %s611_s26 = smov 128   ;;  %s155_s25 = int_to_ptr.vmem [resolvable:$true] %s154_s25 }
   0xa   : > { %p668_p3 = pnand %p398_p0, %p141_p2  ;;  %s612_s27 = smov 8  }
   0xb   : > { %s397_s28 = sadd.s32 4294967294, %s608_s18   ;;  %s679_s29 = sadd.s32 1, %s608_s18  }
   0xc   : > { %p420_p4 = pneg %p668_p3  ;;  %s28_s30 = sadd.s32 1, %s604_s17 }
   0xd   : > { %s25_s5 = ssub.s32 %s608_s18, %s679_s29  ;;  %p35_p7 = scmp.ne.s32.totalorder %s604_s17, %s600_s16 }
   0xe   : > { %p421_p6 = pnand %p420_p4, %p42_p1  ;;  %p26_p8 = scmp.eq.s32.totalorder %s25_s5, 0 }
   0xf   : > { %p36_p9 = scmp.eq.s32.totalorder %s608_s18, 0  ;;  %p41_p10 = scmp.ne.s32.totalorder %s600_s16, %s596_s15 }
  0x10   : > { %423 = dma.hbm_to_vmem [thread:$0]  (!%p421_p6), %s153_s21, 512, %s155_s25, [#allocation6], %s611_s26, %s611_s26, %s612_s27  }
  0x11   : > { %p128_p11 = scmp.eq.s32.totalorder %s663_s22, 1  ;;  %p695_p12 = por %p42_p1, %p41_p10 }
  0x12   : > { %s691_s6 = scalar_select %p26_p8, %s604_s17, %s28_s30  }
  0x13   : > { %p699_p13 = por %p128_p11, %p35_p7  ;;  %p134_p0 = scmp.eq.s32.totalorder %s397_s28, 1 }
  0x14   : > { %p37_p2 = por %p36_p9, %p35_p7  ;;  %s174_s9 = sand.u32 1, %s604_s17  }
  0x15   : > { %p704_p4 = por %p134_p0, %p41_p10  ;;  %p433_p6 = scmp.lt.s32.totalorder %s608_s18, 2 }
  0x16   : > { %s401_s11 = sshll.u32 %s174_s9, 3  ;;  %s402_s12 = sshll.u32 %s608_s18, 3 }
  0x17   : > { %s182_s19 = scalar_lea.hbm %s789_s0, %s402_s12  ;;  %s178_s21 = scalar_lea.vmem [#allocation2], %s401_s11 }
  0x18   : > { %s184_s20 = sshll.u32 %s182_s19, 4  ;;  %s186_s24 = sshll.u32 %s178_s21, 4  ;;  %s185_s20 = int_to_ptr.hbm [resolvable:$true] %s184_s20  ;;  %s187_s24 = int_to_ptr.vmem [resolvable:$true] %s186_s24 }
  0x19   : > { %p713_p8 = pnand %p433_p6, %p37_p2  ;;  %s175_s26 = scalar_lea.sflag [#allocation3], %s174_s9 }
  0x1a   : > { %s508_s27 = sshra.s32 %s185_s20, 4  ;;  %s515_s11 = scalar_lea.hbm %s789_s0, 16  ;;  %s509_s27 = int_to_ptr.hbm [resolvable:$true] %s508_s27 }
  0x1b   : > { %s510_s28 = scalar_lea.hbm %s509_s27, 8  ;;  %p512_p9 = pneg %p713_p8 }
  0x1c   : > { %p511_p7 = scmp.ne.s32.totalorder %s509_s27, %s510_s28  ;;  %p516_p0 = scmp.lt.s32.totalorder %s509_s27, %s789_s0 }
  0x1d   : > { %p517_p2 = scmp.lt.s32.totalorder %s515_s11, %s510_s28 }
  0x1e   : > { %p513_p10 = pnand %p512_p9, %p511_p7 }
  0x1f   : > { %p518_p6 = por %p517_p2, %p516_p0 }
  0x20   : > { %p514_p11 = pneg %p513_p10 }
  0x22   : > { %p519_p5 = pnand %p518_p6, %p514_p11 }
  0x24   : > { %522 = shalt.err (!%p519_p5)
}
  0x25   : > { %427 = dma.hbm_to_vmem [thread:$0]  (!%p713_p8), %s185_s20, 128, %s187_s24, %s175_s26  }
  0x26   : > { %195 = sbr.rel (%p668_p3) target bundleno = 453 (0x1c5), region = 36  ;;  %s730_s9 = sand.u32 (!%p668_p3), 1, %s600_s16  }
  0x27   : > { %s404_s14 = sshll.u32 (!%p668_p3), %s730_s9, 3  ;;  %s198_s19 = scalar_lea.sflag (!%p668_p3), [#allocation3], %s730_s9 }
  0x28   : > { %s201_s21 = scalar_lea.vmem (!%p668_p3), [#allocation2], %s404_s14 }
  0x2b   : > { %583 = dma.done.wait (%p695_p12), %s198_s19, 128  }
  0x2c   : > { %585 = vsyncadd (%p695_p12), %s198_s19, 4294967168 }
  0x2d   : > { %587 = dma.done.wait (%p42_p1), [#allocation6], 512  }
  0x2e   : > { %589 = vsyncadd (%p42_p1), [#allocation6], 4294966784  ;;  %v236_v0 = vld [vmem:[#allocation5 + $0x18] sm:$0xff]  ;;  %v235_v1 = vld [vmem:[#allocation5 + $0x10] sm:$0xff]  ;;  %vm237_vm0 = vcmask 261120   ;;  %v613_v8 = vmov 32.0  }
  0x2f   : > { %253 = vmatpush.msra.mxu0 %v236_v0  ;;  %v234_v2 = vld [vmem:[#allocation5 + $0x8] sm:$0xff]  ;;  %v233_v3 = vld [vmem:[#allocation5] sm:$0xff]  ;;  %v232_v4 = vld [vmem:[%s201_s21] sm:$0xff]  ;;  %474 = vrcp.f32 %v613_v8  ;;  %s409_s23 = sshll.u32 %s663_s22, 3  ;;  %s231_s22 = scalar_lea.vmem [#allocation7], %s404_s14 }
  0x30   : > { %v472_v29 = vld [vmem:[%s791_s2] ss:$0 sm:$0xff]  ;;  %s312_s26 = scalar_lea.hbm %s793_s4, %s409_s23  ;;  %s314_s30 = sshll.u32 %s231_s22, 4  ;;  %s315_s30 = int_to_ptr.vmem [resolvable:$true] %s314_s30 }
  0x31   : > { %254 = vmatpush.msra.mxu0 %v235_v1  ;;  %v473_v32 = vld [vmem:[%s792_s3] ss:$0 sm:$0xff]  ;;  %s316_s5 = sshll.u32 %s312_s26, 4  ;;  %s302_s11 = scalar_lea.sflag [#allocation4], %s730_s9  ;;  %s317_s5 = int_to_ptr.hbm [resolvable:$true] %s316_s5 }
  0x32   : > { %s552_s12 = sshra.s32 %s317_s5, 4  ;;  %s558_s14 = scalar_lea.hbm %s793_s4, 16  ;;  %s553_s12 = int_to_ptr.hbm [resolvable:$true] %s552_s12 }
  0x33   : > { %255 = vmatpush.msra.mxu0 %v234_v2  ;;  %s554_s13 = scalar_lea.hbm %s553_s12, 8  ;;  %p559_p12 = scmp.lt.s32.totalorder %s553_s12, %s793_s4 }
  0x34   : > { %p555_p1 = scmp.ne.s32.totalorder %s553_s12, %s554_s13  ;;  %p560_p8 = scmp.lt.s32.totalorder %s558_s14, %s554_s13 }
  0x35   : > { %256 = vmatpush.msra.mxu0 %v233_v3  ;;  %v475_v9 = vpop.eup %474 }
  0x36   : > { %407 = vmatmul.msk.f32.vlgmr.msra.gmra.mxu0 %vm237_vm0, %v232_v4  ;;  %v267_v10 = vmul.f32 32.0, %v475_v9  ;;  %vm271_vm1 = vweird.f32 %v475_v9  ;;  %p556_p3 = pnand %p555_p1, %p699_p13  ;;  %p561_p7 = por %p560_p8, %p559_p12 }
  0x38   : > { %v268_v11 = vsub.f32 1.0, %v267_v10  ;;  %p557_p5 = pneg %p556_p3 }
  0x3a   : > { %v269_v12 = vmul.f32 %v475_v9, %v268_v11  ;;  %p562_p9 = pnand %p561_p7, %p557_p5 }
  0x3c   : > { %v270_v13 = vadd.f32 %v475_v9, %v269_v12 }
  0x3e   : > { %v272_v14 = vsel %vm271_vm1, %v475_v9, %v270_v13 }
  0xb3   : > { %v258_v5 = vpop.f32.mrf.mxu0 }
  0xb4   : > { %v259_v6 = vadd.f32 %v258_v5, %v232_v4 }
  0xb6   : > { %v263_v7 = vsel %vm237_vm0, %v259_v6, 0.0 }
  0xb7   : > { %264 = vadd.xlane.f32.xlu0 %v263_v7 }
 0x12a   : > { %v265_v15 = vpop.xlane.xlu0 %264 }
 0x12b   : > { %v273_v16 = vmul.f32 %v272_v14, %v265_v15 }
 0x12d   : > { %v274_v17 = vsub.f32 %v259_v6, %v273_v16 }
 0x12f   : > { %v275_v18 = vmul.f32 %v274_v17, %v274_v17 }
 0x131   : > { %v276_v19 = vsel %vm237_vm0, %v275_v18, 0.0 }
 0x132   : > { %277 = vadd.xlane.f32.xlu0 %v276_v19 }
 0x1a5   : > { %v278_v20 = vpop.xlane.xlu0 %277 }
 0x1a6   : > { %v279_v21 = vmul.f32 %v278_v20, %v272_v14 }
 0x1a8   : > { %v280_v22 = vadd.f32 1e-05, %v279_v21 }
 0x1aa   : > { %476 = vrsqrt.f32 %v280_v22  ;;  %vm287_vm3 = vweird.f32 %v280_v22 }
 0x1b0   : > { %v477_v23 = vpop.eup %476 }
 0x1b1   : > { %v282_v24 = vmul.f32 %v477_v23, %v280_v22  ;;  %vm288_vm2 = vweird.f32 %v477_v23 }
 0x1b2   : > { %vm289_vm4 = vmor %vm287_vm3, %vm288_vm2 }
 0x1b3   : > { %v283_v25 = vmul.f32 %v477_v23, %v282_v24 }
 0x1b5   : > { %v284_v26 = vmul.f32 0.5, %v283_v25 }
 0x1b7   : > { %v285_v27 = vsub.f32 1.5, %v284_v26 }
 0x1b9   : > { %v286_v28 = vmul.f32 %v477_v23, %v285_v27 }
 0x1bb   : > { %v290_v30 = vsel %vm289_vm4, %v477_v23, %v286_v28 }
 0x1bc   : > { %v291_v31 = vmul.f32 %v290_v30, %v274_v17 }
 0x1be   : > { %v295_v33 = vmul.f32 %v472_v29, %v291_v31 }
 0x1c0   : > { %v299_v34 = vadd.f32 %v473_v32, %v295_v33 }
 0x1c2   : > { %300 = vst.msk [vmem:[%s231_s22] sm:$0xff] %vm237_vm0, %v299_v34 }
 0x1c3   : > { %565 = shalt.err (!%p562_p9)
}
 0x1c4   : > { %418 = dma.vmem_to_hbm [thread:$0]  (%p699_p13), %s315_s30, 128, %s317_s5, %s302_s11  }
 0x1c5 PF: > { %s328_s9 = sand.u32 1, %s596_s15   ;;  %p799_p10 = scmp.ge.s32.totalorder %s608_s18, 2 }
 0x1c6   : > { %s329_s20 = scalar_lea.sflag [#allocation4], %s328_s9 }
 0x1c7   : > { %p429_p11 = pnand %p799_p10, %p704_p4 }
 0x1c9   : > { %p430_p0 = pneg %p429_p11 }
 0x1cb   : > { %591 = dma.done.wait (%p430_p0), %s329_s20, 128  }
 0x1cc   : > { %593 = vsyncadd (%p430_p0), %s329_s20, 4294967168  ;;  %p18_p2 = scmp.ge.s32.totalorder %s679_s29, 4   ;;  %s800_s15 = smov %s600_s16 }
 0x1cd   : > { %s801_s16 = smov %s604_s17  ;;  %s802_s17 = smov %s691_s6 }
 0x1ce   : > { %s803_s18 = smov %s679_s29  ;;  %20 = sbr.rel (!%p18_p2) target bundleno = 6 (0x6), region = 85 }
 0x1d3   :  { %335 = vsyncpa [#allocation3], 1 }
 0x1d4   :  { %337 = vsyncpa [#allocation3 + $0x1], 1 }
 0x1d5   :  { %338 = vsyncpa [#allocation6], 1 }
 0x1d6   :  { %339 = vsyncpa [#allocation4], 1 }
 0x1d7   :  { %341 = vsyncpa [#allocation4 + $0x1], 1 }

</bundles_post_ra>
